<compile_context>
chip_gen: v5e
topology: v5e:2x2
jax: 0.10.0
libtpu: 0.0.40
codegen_flags: <defaults>
</compile_context>

<pallas_src>
import jax
import jax.numpy as jnp
import numpy as np
from jax import lax
from jax.experimental import pallas as pl
from jax.experimental.pallas import tpu as pltpu


def _round_up(x, m):
    return ((x + m - 1) // m) * m


def planar_kernel(z_ref, w_ref, u_hat_ref, scal_ref, z_out_ref, logdet_ref):
    z = z_ref[...].astype(jnp.float32)   # (TB, D)
    w = w_ref[...]                       # (1, D)  f32 (resident, same block every step)
    u_hat = u_hat_ref[...]               # (1, D)  f32 (resident)
    wu = scal_ref[0]                     # scalar f32 (SMEM) : sum(w * u_hat)
    b = scal_ref[1]                      # scalar f32 (SMEM) : bias

    # ---- z_out path (column / sublane layout, broadcasts over D) ----
    lin_col = jnp.sum(w * z, axis=1, keepdims=True) + b        # (TB, 1)
    t_col = jnp.tanh(lin_col)                                   # (TB, 1)
    z_out_ref[...] = (z + u_hat * t_col).astype(z_out_ref.dtype)

    # ---- logdet path (lane-dense row layout); reduce done on the idle MXU ----
    lin_row = lax.dot_general(
        w, z, (((1,), (1,)), ((), ())),
        preferred_element_type=jnp.float32,
        precision=lax.Precision.HIGHEST) + b                    # (1, TB)
    t_row = jnp.tanh(lin_row)
    h_prime = 1.0 - t_row * t_row                               # sech^2(lin), (1, TB)
    ld_row = jnp.log(jnp.abs(1.0 + wu * h_prime))               # (1, TB)
    logdet_ref[...] = ld_row.reshape(logdet_ref.shape)          # (1, 1, TB) dense store


def _tpu_vmem_capacity_bytes():
    try:
        return int(pltpu.get_tpu_info().vmem_capacity_bytes)
    except Exception:
        return 64 << 20   # conservative fallback (v7x-sized)


def _pick_block_rows(D, itemsize, scoped_limit_bytes):
    # Dominant VMEM use: double-buffered z-in + z-out blocks = 4 * TB * D_pad * itemsize.
    d_pad = _round_up(D, 128)
    budget = max(scoped_limit_bytes - (6 << 20), 2 << 20)   # leave room for params/logdet/margin
    tb = budget // (4 * d_pad * itemsize)
    tb = max(8, min(tb, 8192))
    if tb >= 128:
        tb = (tb // 128) * 128     # lane-dense logdet writes
    else:
        tb = (tb // 8) * 8
    return tb


def planar_forward(z, w, u, b, *, block_rows=None, donate_z=False):
    """z: (B, D); w, u: (1, D); b: (1,). Returns (z_, log_det) shapes (B, D), (B,)."""
    z_dtype = z.dtype
    w = w.astype(jnp.float32)
    u = u.astype(jnp.float32)
    b = b.astype(jnp.float32)
    B, D = z.shape
    itemsize = jnp.dtype(z_dtype).itemsize

    # ---- parameter math hoisted out of the kernel (done once per call) ----
    inner = jnp.sum(w * u)
    u_hat = u + (jax.nn.softplus(inner) - 1.0 - inner) * w / jnp.sum(w * w)  # (1, D)
    wu = jnp.sum(w * u_hat)                                                  # scalar
    scalars = jnp.stack([wu, b[0]]).astype(jnp.float32)                      # (2,) SMEM

    # ---- generation-aware scoped-VMEM cap ----
    vmem_cap = _tpu_vmem_capacity_bytes()            # 128 MiB v5e/v6e, 64 MiB v7x
    scoped_cap = min(vmem_cap // 2, 64 << 20)        # 64 MiB v5e/v6e, 32 MiB v7x

    # ---- batch tiling ----
    if block_rows is None:
        TB = _pick_block_rows(D, itemsize, scoped_cap)
    else:
        TB = int(block_rows)
    row_align = 8 if itemsize >= 4 else 16           # sublane packing for sub-32-bit dtypes
    TB = max(row_align, (TB // row_align) * row_align)
    TB = min(TB, _round_up(B, row_align))
    # Guarantee >= 2 grid blocks when the batch allows it, so both v7x TensorCores work.
    if pl.cdiv(B, TB) < 2 and B >= 2 * row_align:
        TB = max(row_align, _round_up(pl.cdiv(B, 2), row_align))
    num_blocks = pl.cdiv(B, TB)
    B_pad = num_blocks * TB
    if B_pad != B:
        z = jnp.pad(z, ((0, B_pad - B), (0, 0)))

    # ---- VMEM estimate with (8,128) tile padding, double-buffered ----
    d_pad = _round_up(D, 128)
    tb_lane_pad = _round_up(TB, 128)
    z_bytes = 2 * TB * d_pad * itemsize              # z in (2 buffers)
    zo_bytes = 2 * TB * d_pad * itemsize             # z_out (2 buffers)
    param_bytes = 2 * 2 * 8 * d_pad * 4              # w + u_hat: (1,D) pads to (8,d_pad)
    ld_bytes = 2 * 8 * tb_lane_pad * 4               # logdet block (1,1,TB) pads to (8,TB_pad)
    total = z_bytes + zo_bytes + param_bytes + ld_bytes + (2 << 20)
    vmem_limit = int(max(4 << 20, min(vmem_cap - (8 << 20), total)))

    kwargs = {}
    if donate_z:
        kwargs["input_output_aliases"] = {0: 0}      # z -> z_out (caller must donate z)

    z_out, logdet = pl.pallas_call(
        planar_kernel,
        out_shape=(
            jax.ShapeDtypeStruct((B_pad, D), z_dtype),
            jax.ShapeDtypeStruct((num_blocks, 1, TB), jnp.float32),
        ),
        grid=(num_blocks,),
        in_specs=[
            pl.BlockSpec((TB, D), lambda i: (i, 0)),                  # z stream
            pl.BlockSpec((1, D), lambda i: (0, 0)),                   # w (resident)
            pl.BlockSpec((1, D), lambda i: (0, 0)),                   # u_hat (resident)
            pl.BlockSpec(memory_space=pltpu.MemorySpace.SMEM),        # [wu, b]
        ],
        out_specs=(
            pl.BlockSpec((TB, D), lambda i: (i, 0)),                  # z_out stream
            pl.BlockSpec((1, 1, TB), lambda i: (i, 0, 0)),            # logdet, lane-dense
        ),
        compiler_params=pltpu.CompilerParams(
            dimension_semantics=("parallel",),
            vmem_limit_bytes=vmem_limit,
        ),
        **kwargs,
    )(z, w, u_hat, scalars)

    return z_out[:B], logdet.reshape(B_pad)[:B]


def planar_forward_ref(z, w, u, b):
    """Pure-JAX reference mirroring the PyTorch forward (tanh branch)."""
    inner = jnp.sum(w * u)
    u_hat = u + (jax.nn.softplus(inner) - 1.0 - inner) * w / jnp.sum(w ** 2)
    lin = jnp.sum(w * z, axis=1) + b[0]
    z_ = z + u_hat * jnp.tanh(lin)[:, None]
    log_det = jnp.log(jnp.abs(1.0 + jnp.sum(w * u_hat) * (1.0 / jnp.cosh(lin) ** 2)))
    return z_, log_det


if __name__ == "__main__":
    # latent shape = (D,), batch B (small shapes; block_rows=16 exercises the
    # multi-block grid and the batch-padding path: 24 rows -> 2 blocks of 16).
    B, D = 24, 128
    key = jax.random.PRNGKey(0)
    k_z, k_u, k_w = jax.random.split(key, 3)

    lim_w = np.sqrt(2.0 / D)
    lim_u = np.sqrt(2.0)

    z = jax.random.normal(k_z, (B, D), dtype=jnp.float32)
    u = jax.random.uniform(k_u, (1, D), minval=-lim_u, maxval=lim_u, dtype=jnp.float32)
    w = jax.random.uniform(k_w, (1, D), minval=-lim_w, maxval=lim_w, dtype=jnp.float32)
    b = jnp.zeros((1,), dtype=jnp.float32)

    z_ref, ld_ref = planar_forward_ref(z, w, u, b)

    # Explicit small block (multi-block grid + padding path).
    z_out, log_det = planar_forward(z, w, u, b, block_rows=16)
    jax.block_until_ready((z_out, log_det))
    np.testing.assert_allclose(np.asarray(z_out), np.asarray(z_ref), rtol=1e-5, atol=1e-5)
    np.testing.assert_allclose(np.asarray(log_det), np.asarray(ld_ref), rtol=1e-5, atol=1e-5)

    # Default (production-sized, generation-aware) block picker.
    z_out2, log_det2 = planar_forward(z, w, u, b)
    jax.block_until_ready((z_out2, log_det2))
    np.testing.assert_allclose(np.asarray(z_out2), np.asarray(z_ref), rtol=1e-5, atol=1e-5)
    np.testing.assert_allclose(np.asarray(log_det2), np.asarray(ld_ref), rtol=1e-5, atol=1e-5)

    print("KERNEL_OK")
</pallas_src>

<mosaic_0001>
module attributes {stable_mosaic.version = 11 : i64} {
  func.func @planar_kernel(%arg0: i32, %arg1: memref<16x128xf32, #tpu.memory_space<vmem>>, %arg2: memref<1x128xf32, #tpu.memory_space<vmem>>, %arg3: memref<1x128xf32, #tpu.memory_space<vmem>>, %arg4: memref<2xf32, #tpu.memory_space<smem>>, %arg5: memref<16x128xf32, #tpu.memory_space<vmem>>, %arg6: memref<1x1x16xf32, #tpu.memory_space<vmem>>) attributes {dimension_semantics = [#tpu.dimension_semantics<parallel>], iteration_bounds = array<i64: 2>, scalar_prefetch = 0 : i64, scratch_operands = 0 : i64, tpu.core_type = #tpu.core_type<tc>, window_params = [{transform_indices = @transform_0, window_bounds = array<i64: 16, 128>}, {pipeline_mode = #tpu.pipeline_mode<synchronous>, transform_indices = @transform_1, window_bounds = array<i64: 1, 128>}, {pipeline_mode = #tpu.pipeline_mode<synchronous>, transform_indices = @transform_2, window_bounds = array<i64: 1, 128>}, {transform_indices = @transform_3, window_bounds = array<i64: 2>}, {transform_indices = @transform_4, window_bounds = array<i64: 16, 128>}, {transform_indices = @transform_5, window_bounds = array<i64: 1, 1, 16>}]} {
    %c0 = arith.constant 0 : index
    %c0_0 = arith.constant 0 : index
    %0 = vector.load %arg1[%c0, %c0_0] : memref<16x128xf32, #tpu.memory_space<vmem>>, vector<16x128xf32>
    %c0_1 = arith.constant 0 : index
    %c0_2 = arith.constant 0 : index
    %1 = vector.load %arg2[%c0_1, %c0_2] : memref<1x128xf32, #tpu.memory_space<vmem>>, vector<1x128xf32>
    %c0_3 = arith.constant 0 : index
    %c0_4 = arith.constant 0 : index
    %2 = vector.load %arg3[%c0_3, %c0_4] : memref<1x128xf32, #tpu.memory_space<vmem>>, vector<1x128xf32>
    %c0_5 = arith.constant 0 : index
    %3 = memref.load %arg4[%c0_5] : memref<2xf32, #tpu.memory_space<smem>>
    %c1 = arith.constant 1 : index
    %4 = memref.load %arg4[%c1] : memref<2xf32, #tpu.memory_space<smem>>
    %5 = vector.broadcast %1 : vector<1x128xf32> to vector<16x128xf32>
    %6 = arith.mulf %5, %0 : vector<16x128xf32>
    %cst = arith.constant dense<0.000000e+00> : vector<16xf32>
    %7 = vector.multi_reduction <add>, %6, %cst [1] : vector<16x128xf32> to vector<16xf32>
    %8 = vector.shape_cast %7 : vector<16xf32> to vector<16x1xf32>
    %9 = vector.broadcast %4 : f32 to vector<16x1xf32>
    %10 = arith.addf %8, %9 : vector<16x1xf32>
    %11 = math.tanh %10 : vector<16x1xf32>
    %12 = vector.broadcast %2 : vector<1x128xf32> to vector<16x128xf32>
    %13 = vector.broadcast %11 : vector<16x1xf32> to vector<16x128xf32>
    %14 = arith.mulf %12, %13 : vector<16x128xf32>
    %15 = arith.addf %0, %14 : vector<16x128xf32>
    %c0_6 = arith.constant 0 : index
    %c0_7 = arith.constant 0 : index
    %16 = vector.load %arg5[%c0_6, %c0_7] : memref<16x128xf32, #tpu.memory_space<vmem>>, vector<16x128xf32>
    tpu.vector_store %arg5[%c0_6, %c0_7], %15 {strides = array<i32>} : memref<16x128xf32, #tpu.memory_space<vmem>>, vector<16x128xf32>,
    %cst_8 = arith.constant dense<0.000000e+00> : vector<1x16xf32>
    %17 = tpu.matmul %1, %0, %cst_8 {dimension_numbers = #tpu.dot_dimension_numbers<[1], [1], [0], [0], [0, 0, 1, 0], [], []>, precision = #tpu.contract_precision<fp32>} : vector<1x128xf32>, vector<16x128xf32>, vector<1x16xf32> -> vector<1x16xf32>
    %18 = vector.broadcast %4 : f32 to vector<1x16xf32>
    %19 = arith.addf %17, %18 : vector<1x16xf32>
    %20 = math.tanh %19 : vector<1x16xf32>
    %21 = arith.mulf %20, %20 : vector<1x16xf32>
    %cst_9 = arith.constant 1.000000e+00 : f32
    %22 = vector.broadcast %cst_9 : f32 to vector<1x16xf32>
    %23 = arith.subf %22, %21 : vector<1x16xf32>
    %24 = vector.broadcast %3 : f32 to vector<1x16xf32>
    %25 = arith.mulf %24, %23 : vector<1x16xf32>
    %cst_10 = arith.constant 1.000000e+00 : f32
    %26 = vector.broadcast %cst_10 : f32 to vector<1x16xf32>
    %27 = arith.addf %26, %25 : vector<1x16xf32>
    %28 = math.absf %27 : vector<1x16xf32>
    %29 = math.log %28 : vector<1x16xf32>
    %30 = vector.shape_cast %29 : vector<1x16xf32> to vector<1x1x16xf32>
    %c0_11 = arith.constant 0 : index
    %c0_12 = arith.constant 0 : index
    %c0_13 = arith.constant 0 : index
    %31 = vector.load %arg6[%c0_11, %c0_12, %c0_13] : memref<1x1x16xf32, #tpu.memory_space<vmem>>, vector<1x1x16xf32>
    tpu.vector_store %arg6[%c0_11, %c0_12, %c0_13], %30 {strides = array<i32>} : memref<1x1x16xf32, #tpu.memory_space<vmem>>, vector<1x1x16xf32>,
    return
  }
  func.func @transform_0(%arg0: i32) -> (i32, i32) {
    %c0_i32 = arith.constant 0 : i32
    %c0_i32_0 = arith.constant 0 : i32
    return %arg0, %c0_i32 : i32, i32
  }
  func.func @transform_1(%arg0: i32) -> (i32, i32) {
    %c0_i32 = arith.constant 0 : i32
    %c0_i32_0 = arith.constant 0 : i32
    %c0_i32_1 = arith.constant 0 : i32
    return %c0_i32, %c0_i32_0 : i32, i32
  }
  func.func @transform_2(%arg0: i32) -> (i32, i32) {
    %c0_i32 = arith.constant 0 : i32
    %c0_i32_0 = arith.constant 0 : i32
    %c0_i32_1 = arith.constant 0 : i32
    return %c0_i32, %c0_i32_0 : i32, i32
  }
  func.func @transform_3(%arg0: i32) -> i32 {
    %c0_i32 = arith.constant 0 : i32
    %c0_i32_0 = arith.constant 0 : i32
    return %c0_i32 : i32
  }
  func.func @transform_4(%arg0: i32) -> (i32, i32) {
    %c0_i32 = arith.constant 0 : i32
    %c0_i32_0 = arith.constant 0 : i32
    return %arg0, %c0_i32 : i32, i32
  }
  func.func @transform_5(%arg0: i32) -> (i32, i32, i32) {
    %c0_i32 = arith.constant 0 : i32
    %c0_i32_0 = arith.constant 0 : i32
    %c0_i32_1 = arith.constant 0 : i32
    return %arg0, %c0_i32, %c0_i32_0 : i32, i32, i32
  }
}

</mosaic_0001>

<bundles_post_ra>
// kernel: tpu_custom_call.1
= control target key start
LH: loop header
LB: loop body
LE: loop exit
PB: predicated region body
PF: predicated region fallthrough
CT: control target
= control target key end

     0   :  { %s1145_s0 = inlined_call_operand.hbm [shape: f32[32,128], index: 0, kind: input, shape index: {}]   ;;  %s1146_s1 = inlined_call_operand.hbm [shape: f32[1,128], index: 1, kind: input, shape index: {}]   ;;  %s1147_s2 = inlined_call_operand.vmem [shape: f32[1,128], index: 2, kind: input, shape index: {}]   ;;  %s1148_s3 = inlined_call_operand.vmem [shape: f32[2], index: 3, kind: input, shape index: {}]   ;;  %s1149_s4 = inlined_call_operand.hbm [shape: f32[32,128], index: 4, kind: output, shape index: {0}]   ;;  %s1150_s5 = inlined_call_operand.hbm [shape: f32[2,1,16], index: 5, kind: output, shape index: {1}]  }
   0x1   :  { %1151 = sst [smem:[#allocation17_spill]] %s1146_s1 }
   0x2   :  { %1152 = sst [smem:[#allocation18_spill]] %s1148_s3 }
   0x3   :  { %11 = vsyncpa [#allocation3], 0 }
   0x4   :  { %13 = vsyncpa [#allocation3 + $0x1], 0 }
   0x5   :  { %14 = vsyncpa [#allocation7], 0 }
   0x6   :  { %15 = vsyncpa [#allocation5], 0 }
   0x7   :  { %16 = vsyncpa [#allocation4], 0 }
   0x8   :  { %18 = vsyncpa [#allocation4 + $0x1], 0 }
   0x9   :  { %19 = vsyncpa [#allocation11], 0 }
   0xa   :  { %21 = vsyncpa [#allocation11 + $0x1], 0  ;;  %s967_s18 = smov 0   ;;  %s969_s19 = smov 0  }
   0xb   :  { %s971_s20 = smov 0   ;;  %s973_s21 = smov 0  }
   0xc LB: > { %s988_s22 = sadd.s32 4294967295, %s929_s21   ;;  %s641_s23 = sadd.s32 4294967294, %s929_s21   ;;  %s929_s21 = sphi %s973_s21, %s1165_s21   ;;  %s925_s20 = sphi %s971_s20, %s1164_s20   ;;  %s921_s19 = sphi %s969_s19, %s1163_s19   ;;  %s917_s18 = sphi %s967_s18, %s1162_s18  }
   0xd   : > { %s992_s24 = sadd.s32 1, %s929_s21   ;;  %s34_s25 = sadd.s32 1, %s925_s20 }
   0xe   : > { %s31_s26 = ssub.s32 %s929_s21, %s992_s24  ;;  %p41_p0 = scmp.ne.s32.totalorder %s925_s20, %s921_s19 }
   0xf   : > { %p32_p1 = scmp.eq.s32.totalorder %s31_s26, 0  ;;  %p42_p2 = scmp.eq.s32.totalorder %s929_s21, 0 }
  0x10   : > { %p47_p3 = scmp.ne.s32.totalorder %s921_s19, %s917_s18  ;;  %p48_p4 = scmp.eq.s32.totalorder %s988_s22, 0 }
  0x11   : > { %s1004_s27 = scalar_select %p32_p1, %s925_s20, %s34_s25  }
  0x12   : > { %p1006_p5 = por %p42_p2, %p41_p0  ;;  %p1012_p6 = por %p48_p4, %p47_p3 }
  0x13   : > { %p134_p7 = scmp.eq.s32.totalorder %s988_s22, 1  ;;  %p140_p8 = scmp.eq.s32.totalorder %s641_s23, 1 }
  0x14   : > { %p642_p9 = scmp.ge.s32.totalorder %s929_s21, 1  ;;  %p173_p10 = scmp.lt.s32.totalorder %s929_s21, 3 }
  0x15   : > { %p1019_p11 = por %p134_p7, %p41_p0  ;;  %p1023_p12 = por %p140_p8, %p47_p3 }
  0x16   : > { %p1027_p13 = pnand %p642_p9, %p173_p10  ;;  %s1158_s1 = sld [smem:[#allocation17_spill]] }
  0x17   : > { %s931_s11 = smov [#allocation6]   ;;  %p696_p3 = scmp.lt.s32.totalorder %s929_s21, 2 }
  0x18   : > { %p676_p1 = pneg %p1027_p13  ;;  %s187_s12 = sshll.u32 %s931_s11, 4  ;;  %s188_s12 = int_to_ptr.vmem [resolvable:$true] %s187_s12 }
  0x19   : > { %s1159_s3 = sld [smem:[#allocation18_spill]]  ;;  %p1045_p7 = pnand %p696_p3, %p1006_p5 }
  0x1a   : > { %p677_p2 = pnand %p676_p1, %p48_p4  ;;  %s932_s17 = smov [#allocation8]  }
  0x1b   : > { %s211_s23 = sand.u32 1, %s925_s20   ;;  %s660_s26 = sshll.u32 %s929_s21, 4 }
  0x1c   : > { %s185_s10 = sshll.u32 %s1158_s1, 4  ;;  %s646_s25 = sshll.u32 %s211_s23, 4  ;;  %s186_s10 = int_to_ptr.hbm [resolvable:$true] %s185_s10 }
  0x1d   : > { %679 = dma.hbm_to_vmem [thread:$0]  (!%p677_p2), %s186_s10, 16, %s188_s12, [#allocation7]  }
  0x1e   : > { %s220_s11 = scalar_lea.hbm %s1145_s0, %s660_s26  ;;  %s215_s1 = scalar_lea.vmem [#allocation2], %s646_s25 }
  0x1f   : > { %s200_s15 = sshll.u32 %s1159_s3, 4  ;;  %s223_s13 = sshll.u32 %s215_s1, 4  ;;  %s201_s15 = int_to_ptr.vmem [resolvable:$true] %s200_s15  ;;  %s224_s13 = int_to_ptr.vmem [resolvable:$true] %s223_s13 }
  0x20   : > { %682 = dma.vmem_to_smem (!%p677_p2), %s201_s15, 16, %s932_s17, [#allocation5]  }
  0x21   : > { %s221_s14 = sshll.u32 %s220_s11, 4  ;;  %s212_s28 = scalar_lea.sflag [#allocation3], %s211_s23  ;;  %s222_s14 = int_to_ptr.hbm [resolvable:$true] %s221_s14 }
  0x22   : > { %s793_s10 = sshra.s32 %s222_s14, 4  ;;  %p797_p8 = pneg %p1045_p7  ;;  %s794_s10 = int_to_ptr.hbm [resolvable:$true] %s793_s10 }
  0x23   : > { %s795_s12 = scalar_lea.hbm %s794_s10, 16  ;;  %s800_s3 = scalar_lea.hbm %s1145_s0, 32 }
  0x24   : > { %p796_p5 = scmp.ne.s32.totalorder %s794_s10, %s795_s12  ;;  %p801_p1 = scmp.lt.s32.totalorder %s794_s10, %s1145_s0 }
  0x25   : > { %p802_p2 = scmp.lt.s32.totalorder %s800_s3, %s795_s12 }
  0x26   : > { %p798_p9 = pnand %p797_p8, %p796_p5 }
  0x27   : > { %p803_p3 = por %p802_p2, %p801_p1 }
  0x28   : > { %p799_p10 = pneg %p798_p9 }
  0x2a   : > { %p804_p0 = pnand %p803_p3, %p799_p10 }
  0x2c   : > { %807 = shalt.err (!%p804_p0)
}
  0x2d   : > { %s933_s1 = smov 128   ;;  %s934_s23 = smov 8  }
  0x2e   : > { %686 = dma.hbm_to_vmem [thread:$0]  (!%p1045_p7), %s222_s14, 256, %s224_s13, %s212_s28, %s933_s1, %s933_s1, %s934_s23  }
  0x2f   : > { %235 = sbr.rel (%p1027_p13) target bundleno = 242 (0xf2), region = 36  ;;  %s1067_s25 = sand.u32 (!%p1027_p13), 1, %s921_s19  }
  0x30   : > { %s650_s9 = sshll.u32 (!%p1027_p13), %s1067_s25, 4  ;;  %s238_s3 = scalar_lea.sflag (!%p1027_p13), [#allocation3], %s1067_s25 }
  0x31   : > { %s241_s11 = scalar_lea.vmem (!%p1027_p13), [#allocation2], %s650_s9 }
  0x34   : > { %896 = dma.done.wait (%p1012_p6), %s238_s3, 256  }
  0x35   : > { %898 = vsyncadd (%p1012_p6), %s238_s3, 4294967040 }
  0x36   : > { %900 = dma.done.wait (%p48_p4), [#allocation7], 16  }
  0x37   : > { %902 = vsyncadd (%p48_p4), [#allocation7], 4294967280 }
  0x38   : > { %904 = dma.done.wait (%p48_p4), [#allocation5], 16  }
  0x39   : > { %906 = vsyncadd (%p48_p4), [#allocation5], 4294967280 }
  0x3a   : > { %257 = sfence }
  0x3b   : > { %v1085_v0 = vld [vmem:[%s241_s11 + $0x8] sm:$0xff]  ;;  %v286_v1 = vld [vmem:[%s241_s11] sm:$0xff]  ;;  %s654_s29 = sld [smem:[#allocation8 + $0x1]]  ;;  %s661_s13 = sshll.u32 %s988_s22, 4 }
  0x3c   : > { %v288_v2 = vld [vmem:[#allocation6] sm:$0x1]  ;;  %v329_v3 = vand.u32 4294901760, %v1085_v0  ;;  %v331_v4 = vand.u32 4294901760, %v286_v1  ;;  %s277_s14 = scalar_lea.vmem [#allocation9], %s650_s9  ;;  %s501_s12 = scalar_lea.hbm %s1149_s4, %s661_s13 }
  0x3d   : > { %v333_v5 = vand.u32 4294901760, %v288_v2  ;;  %v738_v6 = vld [vmem:[#allocation6] ss:$0 sm:$0xff]  ;;  %s502_s15 = sshll.u32 %s277_s14, 4  ;;  %s504_s17 = sshll.u32 %s501_s12, 4  ;;  %s503_s15 = int_to_ptr.vmem [resolvable:$true] %s502_s15  ;;  %s505_s17 = int_to_ptr.hbm [resolvable:$true] %s504_s17 }
  0x3e   : > { %v357_v7 = vsub.f32 %v1085_v0, %v329_v3  ;;  %330 = vmatpush.xpose.msra.mxu0 %v329_v3  ;;  %414 = vmatpush.xpose.msra.mxu3 %v329_v3  ;;  %v363_v8 = vsub.f32 %v286_v1, %v331_v4  ;;  %v295_v10 = vmul.f32 %v738_v6, %v286_v1  ;;  %v739_v24 = vld [vmem:[%s1147_s2] ss:$0 sm:$0xff]  ;;  %s486_s8 = scalar_lea.sflag [#allocation4], %s1067_s25  ;;  %s837_s26 = sshra.s32 %s505_s17, 4  ;;  %s838_s26 = int_to_ptr.hbm [resolvable:$true] %s837_s26 }
  0x3f   : > { %v334_v9 = vsub.f32 %v288_v2, %v333_v5  ;;  %v296_v19 = vmul.f32 %v738_v6, %v1085_v0  ;;  %s839_s1 = scalar_lea.hbm %s838_s26, 16  ;;  %s843_s3 = scalar_lea.hbm %s1149_s4, 32 }
  0x40   : > { %389 = vmatpush.xpose.msra.mxu2 %v357_v7  ;;  %v358_v11 = vand.u32 4294901760, %v357_v7  ;;  %v364_v12 = vand.u32 4294901760, %v363_v8  ;;  %297 = vadd.xlane.f32.xlu0 %v295_v10  ;;  %p840_p4 = scmp.ne.s32.totalorder %s838_s26, %s839_s1  ;;  %p844_p0 = scmp.lt.s32.totalorder %s838_s26, %s1149_s4 }
  0x41   : > { %v335_v13 = vand.u32 4294901760, %v334_v9  ;;  %v301_v21 = vstv %s654_s29  ;;  %p845_p7 = scmp.lt.s32.totalorder %s843_s3, %s839_s1 }
  0x42   : > { %v359_v14 = vsub.f32 %v357_v7, %v358_v11  ;;  %332 = vmatpush.xpose.msra.mxu0 %v331_v4  ;;  %416 = vmatpush.xpose.msra.mxu3 %v331_v4  ;;  %v365_v15 = vsub.f32 %v363_v8, %v364_v12  ;;  %p841_p6 = pnand %p840_p4, %p1019_p11 }
  0x43   : > { %v336_v16 = vsub.f32 %v334_v9, %v335_v13  ;;  %p846_p5 = por %p845_p7, %p844_p0 }
  0x44   : > { %v360_v17 = vand.u32 4294901760, %v359_v14  ;;  %392 = vmatpush.xpose.msra.mxu2 %v363_v8  ;;  %v366_v20 = vand.u32 4294901760, %v365_v15  ;;  %p842_p13 = pneg %p841_p6 }
  0x45   : > { %v337_v18 = vand.u32 4294901760, %v336_v16  ;;  %420 = vmatmul.f32.vlgmr.msra.gmra.mxu3 %v335_v13 }
  0x46   : > { %441 = vmatpush.xpose.msrb.mxu0 %v358_v11  ;;  %361 = vmatpush.xpose.msra.mxu1 %v360_v17  ;;  %p847_p8 = pnand %p846_p5, %p842_p13 }
  0x47   : > { %338 = vmatmul.f32.vlgmr.msra.gmra.mxu0 %v337_v18  ;;  %395 = vmatmul.f32.vlgmr.msra.gmra.mxu2 %v334_v9 }
  0x48   : > { %299 = vadd.xlane.f32.xlu0 %v296_v19 }
  0x4a   : > { %445 = vmatpush.xpose.msrb.mxu0 %v364_v12  ;;  %367 = vmatpush.xpose.msra.mxu1 %v366_v20 }
  0x4d   : > { %369 = vmatmul.f32.vlgmr.msra.gmra.mxu1 %v333_v5 }
  0x4e   : > { %466 = vmatpush.xpose.msrb.mxu1 %v329_v3 }
  0x4f   : > { %447 = vmatmul.f32.vlgmr.msrb.gmra.mxu0 %v333_v5 }
  0x52   : > { %468 = vmatpush.xpose.msrb.mxu1 %v331_v4 }
  0x55   : > { %470 = vmatmul.f32.vlgmr.msrb.gmra.mxu1 %v333_v5 }
  0xb3   : > { %v298_v22 = vpop.xlane.xlu0 %297 }
  0xb4   : > { %v302_v23 = vadd.f32 %v301_v21, %v298_v22 }
  0xb6   : > { %740 = vtanh.f32 %v302_v23 }
  0xbb   : > { %v300_v25 = vpop.xlane.xlu0 %299 }
  0xbc   : > { %v741_v26 = vpop.eup %740  ;;  %v303_v27 = vadd.f32 %v301_v21, %v300_v25 }
  0xbd   : > { %v309_v28 = vmul.f32 %v741_v26, %v739_v24 }
  0xbe   : > { %742 = vtanh.f32 %v303_v27 }
  0xbf   : > { %v311_v30 = vadd.f32 %v309_v28, %v286_v1 }
  0xc1   : > { %313 = vst [vmem:[%s277_s14] sm:$0xff] %v311_v30 }
  0xc4   : > { %v339_v29 = vpop.f32.mrf.mxu0  ;;  %v743_v32 = vpop.eup %742 }
  0xc5   : > { %v340_v31 = vadd.f32 %v339_v29, %v301_v21  ;;  %v310_v36 = vmul.f32 %v743_v32, %v739_v24 }
  0xc7   : > { %v312_v39 = vadd.f32 %v310_v36, %v1085_v0 }
  0xc8   : > { %v421_v37 = vpop.f32.mrf.mxu3 }
  0xc9   : > { %314 = vst [vmem:[%s277_s14 + $0x8] sm:$0xff] %v312_v39 }
  0xca   : > { %v370_v33 = vpop.f32.mrf.mxu1  ;;  %v396_v34 = vpop.f32.mrf.mxu2 }
  0xcb   : > { %v371_v35 = vadd.f32 %v370_v33, %v340_v31 }
  0xcc   : > { %v448_v40 = vpop.f32.mrf.mxu0 }
  0xcd   : > { %v397_v38 = vadd.f32 %v396_v34, %v371_v35 }
  0xcf   : > { %v422_v41 = vadd.f32 %v421_v37, %v397_v38 }
  0xd0   : > { %850 = shalt.err (!%p847_p8)
}
  0xd1   : > { %s935_s7 = smov 128   ;;  %s936_s16 = smov 8   ;;  %v449_v42 = vadd.f32 %v448_v40, %v422_v41  ;;  %vm483_vm0 = vcmask 122880  }
  0xd2   : > { %672 = dma.vmem_to_hbm [thread:$0]  (%p1019_p11), %s503_s15, 256, %s505_s17, %s486_s8, %s935_s7, %s935_s7, %s936_s16   ;;  %v471_v43 = vpop.f32.mrf.mxu1 }
  0xd3   : > { %v472_v44 = vadd.f32 %v471_v43, %v449_v42  ;;  %s290_s13 = sld [smem:[#allocation8]]  ;;  %s516_s10 = scalar_lea.hbm %s1150_s5, %s988_s22 }
  0xd4   : > { %s283_s12 = scalar_lea.vmem [#allocation10], %s1067_s25  ;;  %s520_s17 = sshll.u32 %s516_s10, 4  ;;  %s521_s17 = int_to_ptr.hbm [resolvable:$true] %s520_s17 }
  0xd5   : > { %744 = vtanh.f32 %v472_v44  ;;  %s518_s15 = sshll.u32 %s283_s12, 4  ;;  %s491_s8 = scalar_lea.sflag [#allocation11], %s1067_s25  ;;  %s519_s15 = int_to_ptr.vmem [resolvable:$true] %s518_s15 }
  0xd6   : > { %s865_s26 = sshra.s32 %s521_s17, 4  ;;  %s871_s22 = scalar_lea.hbm %s1150_s5, 2  ;;  %s866_s26 = int_to_ptr.hbm [resolvable:$true] %s865_s26 }
  0xd7   : > { %s867_s1 = scalar_lea.hbm %s866_s26, 1  ;;  %p872_p2 = scmp.lt.s32.totalorder %s866_s26, %s1150_s5 }
  0xd8   : > { %p868_p9 = scmp.ne.s32.totalorder %s866_s26, %s867_s1  ;;  %p873_p3 = scmp.lt.s32.totalorder %s871_s22, %s867_s1 }
  0xd9   : > { %v477_v47 = vstv %s290_s13 }
  0xda   : > { %p869_p10 = pnand %p868_p9, %p1019_p11  ;;  %p874_p4 = por %p873_p3, %p872_p2 }
  0xdb   : > { %v745_v45 = vpop.eup %744 }
  0xdc   : > { %v475_v46 = vmul.f32 %v745_v45, %v745_v45  ;;  %p870_p1 = pneg %p869_p10 }
  0xde   : > { %v476_v48 = vsub.f32 1.0, %v475_v46  ;;  %p875_p6 = pnand %p874_p4, %p870_p1 }
  0xe0   : > { %v478_v49 = vmul.f32 %v477_v47, %v476_v48 }
  0xe2   : > { %v479_v50 = vadd.f32 1.0, %v478_v49 }
  0xe4   : > { %v480_v51 = vand.u32 2147483647, %v479_v50 }
  0xe6   : > { %746 = vlog2.f32 %v480_v51 }
  0xec   : > { %v747_v52 = vpop.eup %746 }
  0xed   : > { %v482_v53 = vmul.f32 0.6931472, %v747_v52 }
  0xef   : > { %484 = vst.msk [vmem:[%s283_s12] sm:$0x1] %vm483_vm0, %v482_v53 }
  0xf0   : > { %878 = shalt.err (!%p875_p6)
}
  0xf1   : > { %673 = dma.vmem_to_hbm [thread:$0]  (%p1019_p11), %s519_s15, 16, %s521_s17, %s491_s8  }
  0xf2 PF: > { %s532_s25 = sand.u32 1, %s917_s18   ;;  %p1161_p13 = scmp.ge.s32.totalorder %s929_s21, 2 }
  0xf3   : > { %s533_s29 = scalar_lea.sflag [#allocation4], %s532_s25 }
  0xf4   : > { %p688_p0 = pnand %p1161_p13, %p1023_p12 }
  0xf6   : > { %p689_p7 = pneg %p688_p0 }
  0xf8   : > { %908 = dma.done.wait (%p689_p7), %s533_s29, 256  }
  0xf9   : > { %910 = vsyncadd (%p689_p7), %s533_s29, 4294967040  ;;  %s543_s7 = scalar_lea.sflag [#allocation11], %s532_s25 }
  0xfa   : > { %912 = dma.done.wait (%p689_p7), %s543_s7, 16  }
  0xfb   : > { %914 = vsyncadd (%p689_p7), %s543_s7, 4294967280  ;;  %p24_p11 = scmp.ge.s32.totalorder %s992_s24, 4   ;;  %s1162_s18 = smov %s921_s19 }
  0xfc   : > { %s1163_s19 = smov %s925_s20  ;;  %s1164_s20 = smov %s1004_s27 }
  0xfd   : > { %s1165_s21 = smov %s992_s24  ;;  %26 = sbr.rel (!%p24_p11) target bundleno = 12 (0xc), region = 107 }
 0x102   :  { %548 = vsyncpa [#allocation3], 1 }
 0x103   :  { %550 = vsyncpa [#allocation3 + $0x1], 1 }
 0x104   :  { %551 = vsyncpa [#allocation7], 1 }
 0x105   :  { %552 = vsyncpa [#allocation4], 1 }
 0x106   :  { %554 = vsyncpa [#allocation4 + $0x1], 1 }
 0x107   :  { %555 = vsyncpa [#allocation11], 1 }
 0x108   :  { %557 = vsyncpa [#allocation11 + $0x1], 1 }
 0x109   :  { %558 = vsyncpa [#allocation5], 1 }
 0x10a   :  { %560 = vsyncpa [#allocation5 + $0x1], 1 }

</bundles_post_ra>
